<compile_context>
chip_gen: v7x
topology: tpu7x:2x2x1
jax: 0.10.0
libtpu: 0.0.40
codegen_flags: <defaults>
</compile_context>

<pallas_src>
import jax
import jax.numpy as jnp
from jax import lax
from jax.experimental import pallas as pl
from jax.experimental.pallas import tpu as pltpu


# ---------------------------------------------------------------------------
# pltpu.roll convention probe (run once, eagerly, at weight-prep time).
# We need shifted[r] = y[r + s]; with jnp.roll semantics that is shift = -s.
# ---------------------------------------------------------------------------
_ROLL_SIGN = None


def _probe_roll_sign():
    global _ROLL_SIGN
    if _ROLL_SIGN is not None:
        return _ROLL_SIGN

    def k(x_ref, o_ref):
        o_ref[...] = pltpu.roll(x_ref[...], 1, 0)

    x = jnp.tile(jnp.arange(8, dtype=jnp.float32)[:, None], (1, 128))
    y = pl.pallas_call(k, out_shape=jax.ShapeDtypeStruct((8, 128), jnp.float32))(x)
    # jnp.roll convention: out[0] == x[-1] (= 7)  ->  pass shift = -s.
    _ROLL_SIGN = -1 if float(y[0, 0]) == 7.0 else 1
    return _ROLL_SIGN


# ---------------------------------------------------------------------------
# Fused 6-layer kernel.  Everything inside is 2-D:
#   activations y : (R, L)    R = patches_per_block * patch_size (rows)
#                              L = patch_size * Cmax             (lanes)
#   weights     W : (5L, L)   5 vertical taps stacked along K (banded col-tap x chan)
#   bias        b : (1, L)
# One 5x5 "same" conv:
#   y5  = concat_dy( mask_dy * roll(y, dy-2 rows) )        # (R, 5L), bf16
#   out = relu( y5 @ W + b [+ res] )                       # single K=5L MXU matmul
# ---------------------------------------------------------------------------
def _make_fcn6_kernel(ps, roll_sign):
    def kernel(x_ref, w1, b1, w2, b2, w3, b3, w4, b4, w5, b5, w6, b6, o_ref):
        R, L = x_ref.shape
        # Patch-local row index; masks zero rows whose vertical tap would cross
        # a patch boundary (this also covers rows wrapped by the roll).
        rloc = lax.broadcasted_iota(jnp.int32, (R, L), 0) % ps
        masks = {s: (rloc >= -s) & (rloc < ps - s) for s in (-2, -1, 1, 2)}

        def conv(y, w_ref, b_ref, res=None, relu=True):
            pieces = []
            for dy in range(5):
                s = dy - 2
                if s == 0:
                    pieces.append(y)
                else:
                    rolled = pltpu.roll(y, (roll_sign * s) % R, 0)   # XLU, off MXU path
                    pieces.append(jnp.where(masks[s], rolled, 0.0))
            y5 = jnp.concatenate(pieces, axis=1).astype(jnp.bfloat16)   # (R, 5L)
            out = jnp.dot(y5, w_ref[...], preferred_element_type=jnp.float32)
            out = out + b_ref[...]
            if res is not None:
                out = out + res
            if relu:
                out = jnp.maximum(out, 0.0)
            return out

        a1 = conv(x_ref[...], w1, b1)
        a2 = conv(a1, w2, b2)
        a3 = conv(a2, w3, b3, res=a1)
        a4 = conv(a3, w4, b4)
        a5 = conv(a4, w5, b5, res=a3)
        o_ref[...] = conv(a5, w6, b6, relu=False)

    return kernel


# ---------------------------------------------------------------------------
# Host-side (one-time) weight preparation.
# ---------------------------------------------------------------------------
def _band_conv(w_hwio, bias, cmax, ps):
    """Fold one 5x5 HWIO conv into 5 (L, L) banded matrices + a (1, L) bias row.

    Lane layout: lane = col * cmax + channel.
    M[dy, x*cmax+ci, j*cmax+co] = w[dy, x-j+2, ci, co] (0 outside band / real channels).
    """
    kh, kw, cin, cout = w_hwio.shape
    L = ps * cmax
    wpad = jnp.pad(w_hwio.astype(jnp.float32),
                   ((0, 0), (0, 0), (0, cmax - cin), (0, cmax - cout)))
    idx = jnp.arange(ps)
    sel = (idx[:, None, None] - idx[None, :, None] + kw // 2
           == jnp.arange(kw)[None, None, :]).astype(jnp.float32)
    m = jnp.einsum("xjd,kdab->kxajb", sel, wpad).reshape(kh, L, L)
    brow = jnp.tile(jnp.pad(bias.astype(jnp.float32), (0, cmax - cout)), ps)
    return m, brow.reshape(1, L)


def prepare_params(params, patch_size):
    """One-time prep: stacked (5L, L) bf16 banded weights + f32 bias rows.

    Call this once when weights are loaded (eagerly); pass the result into the
    jitted forward so the banding einsums never run in the per-forward path.
    """
    _probe_roll_sign()
    width = params["w1"].shape[-1]
    cmax = 2 * width
    ps = patch_size
    L = ps * cmax
    prep = {}
    for l in range(1, 7):
        m, b = _band_conv(params[f"w{l}"], params[f"b{l}"], cmax, ps)
        prep[f"W{l}"] = m.reshape(5 * L, L).astype(jnp.bfloat16)   # taps stacked along K
        prep[f"B{l}"] = b                                          # (1, L) f32
    return prep


def _pick_patches_per_block(num_patches, ps, max_rows=512):
    """Large row blocks (<=512 rows), preferring an even number of >=2 grid steps."""
    divs = [d for d in range(1, num_patches + 1) if num_patches % d == 0]
    ok = [d for d in divs if d * ps <= max_rows and (d * ps) % 8 == 0]
    if not ok:
        return num_patches                       # single full-array block (legal)
    even = [d for d in ok if num_patches // d >= 2 and (num_patches // d) % 2 == 0]
    multi = [d for d in ok if num_patches // d >= 2]
    if even:
        return max(even)
    if multi:
        return max(multi)
    return max(ok)


def _run_fcn_patches(patches, prep, cmax):
    """patches: (P, ps, ps) f32 -> (P, ps, ps) f32 network output."""
    num_p, ps, _ = patches.shape
    L = ps * cmax
    pb = _pick_patches_per_block(num_p, ps)
    R = pb * ps
    grid = (num_p // pb,)

    # Lane layout (col * cmax + chan); the single input channel sits at chan 0.
    x2d = jnp.pad(patches[..., None].astype(jnp.float32),
                  ((0, 0), (0, 0), (0, 0), (0, cmax - 1))).reshape(num_p * ps, L)

    roll_sign = _ROLL_SIGN if _ROLL_SIGN is not None else -1
    kernel = _make_fcn6_kernel(ps, roll_sign)

    row_spec = pl.BlockSpec((R, L), lambda i: (i, 0))
    const2 = lambda i: (0, 0)
    in_specs = [row_spec]
    args = [x2d]
    for l in range(1, 7):
        in_specs += [pl.BlockSpec(prep[f"W{l}"].shape, const2),   # resident weights
                     pl.BlockSpec(prep[f"B{l}"].shape, const2)]
        args += [prep[f"W{l}"], prep[f"B{l}"]]

    out2d = pl.pallas_call(
        kernel,
        out_shape=jax.ShapeDtypeStruct((num_p * ps, L), jnp.float32),
        grid=grid,
        in_specs=in_specs,
        out_specs=row_spec,
        compiler_params=pltpu.CompilerParams(
            dimension_semantics=("parallel",),
            vmem_limit_bytes=32 * 1024 * 1024),
    )(*args)

    # Channel 0 of each lane group holds the conv6 output (other lanes are 0).
    return out2d.reshape(num_p, ps, ps, cmax)[..., 0]


# ---------------------------------------------------------------------------
# FCN_Spect forward: patch extraction -> fused FCN -> reassembly
# ---------------------------------------------------------------------------
def _patch_starts(h, w, ps, stride):
    def starts(dim):
        s = list(range(0, dim - ps + 1, stride))
        if (dim - ps) % stride != 0:
            s.append(dim - ps)
        return s
    return [(i, j) for i in starts(h) for j in starts(w)]


def fcn_spect_forward(spect, prep, patch_size):
    """Eval-mode FCN_Spect forward (stride == patch_size), for (1, 1, H, W) input."""
    b, c, h, w = spect.shape
    if b != 1 or c != 1:
        # TODO(synk): for B>1 the original scatter loop broadcasts one patch over
        # the whole batch (a quirk of the PyTorch code); only B == C == 1 here.
        raise NotImplementedError("fcn_spect_forward expects (1, 1, H, W) input")
    if h < patch_size or w < patch_size:
        raise ValueError("patch_size larger than the spectrogram")
    ps = patch_size
    L = prep["W1"].shape[1]
    cmax = L // ps

    if h % ps == 0 and w % ps == 0:
        # Eval patches tile the image exactly: patch_count == 1, so the
        # scatter-add + divide collapses to a reshape/transpose reassembly.
        ni, nj = h // ps, w // ps
        patches = spect[0, 0].reshape(ni, ps, nj, ps).transpose(0, 2, 1, 3)
        patches = patches.reshape(ni * nj, ps, ps)
        preds = _run_fcn_patches(patches, prep, cmax)
        img = preds.reshape(ni, nj, ps, ps).transpose(0, 2, 1, 3).reshape(h, w)
        return img[None, None]

    # General eval path (last patch overlaps): gather + scatter-average glue.
    starts = _patch_starts(h, w, ps, ps)
    patches = jnp.stack([spect[0, 0, i:i + ps, j:j + ps] for i, j in starts], 0)
    preds = _run_fcn_patches(patches, prep, cmax)
    img = jnp.zeros((h, w), jnp.float32)
    cnt = jnp.zeros((h, w), jnp.float32)
    for idx, (i, j) in enumerate(starts):
        img = img.at[i:i + ps, j:j + ps].add(preds[idx])
        cnt = cnt.at[i:i + ps, j:j + ps].add(1.0)
    return (img / cnt)[None, None]


# ---------------------------------------------------------------------------
# Pure-JAX f32 reference (torch-style extraction / scatter-average, lax.conv)
# ---------------------------------------------------------------------------
def _conv_ref(x_nhwc, w, b, res=None, relu=True):
    y = lax.conv_general_dilated(
        x_nhwc, w, (1, 1), "SAME",
        dimension_numbers=("NHWC", "HWIO", "NHWC"),
        precision=lax.Precision.HIGHEST) + b
    if res is not None:
        y = y + res
    if relu:
        y = jnp.maximum(y, 0.0)
    return y


def fcn_spect_forward_ref(spect, params, patch_size):
    ps = patch_size
    h, w = spect.shape[-2:]
    starts = _patch_starts(h, w, ps, ps)
    patches = jnp.concatenate(
        [spect[..., i:i + ps, j:j + ps] for i, j in starts], axis=0)
    x = jnp.transpose(patches, (0, 2, 3, 1))
    a1 = _conv_ref(x, params["w1"], params["b1"])
    a2 = _conv_ref(a1, params["w2"], params["b2"])
    a3 = _conv_ref(a2, params["w3"], params["b3"], res=a1)
    a4 = _conv_ref(a3, params["w4"], params["b4"])
    a5 = _conv_ref(a4, params["w5"], params["b5"], res=a3)
    y = _conv_ref(a5, params["w6"], params["b6"], relu=False)
    preds = jnp.transpose(y, (0, 3, 1, 2))
    img = jnp.zeros_like(spect)
    cnt = jnp.zeros_like(spect)
    for idx, (i, j) in enumerate(starts):
        img = img.at[..., i:i + ps, j:j + ps].add(preds[idx])
        cnt = cnt.at[..., i:i + ps, j:j + ps].add(1.0)
    return img / cnt


# ---------------------------------------------------------------------------
# Deterministic synthetic parameters (BatchNorm folded, eval mode)
# ---------------------------------------------------------------------------
def init_params(key, width, eps=1e-5):
    def conv_p(k, cin, cout):
        k1, k2 = jax.random.split(k)
        wgt = jax.random.normal(k1, (5, 5, cin, cout), jnp.float32) / jnp.sqrt(25.0 * cin)
        bia = 0.1 * jax.random.normal(k2, (cout,), jnp.float32)
        return wgt, bia

    def bn_p(k, c):
        k1, k2, k3, k4 = jax.random.split(k, 4)
        gamma = 1.0 + 0.1 * jax.random.normal(k1, (c,), jnp.float32)
        beta = 0.1 * jax.random.normal(k2, (c,), jnp.float32)
        mean = 0.1 * jax.random.normal(k3, (c,), jnp.float32)
        var = 1.0 + 0.1 * jnp.abs(jax.random.normal(k4, (c,), jnp.float32))
        return gamma, beta, mean, var

    def fold(wgt, bia, bn):
        gamma, beta, mean, var = bn
        scale = gamma / jnp.sqrt(var + eps)
        return wgt * scale, (bia - mean) * scale + beta

    keys = jax.random.split(key, 10)
    w1, b1 = conv_p(keys[0], 1, width)
    w2, b2 = fold(*conv_p(keys[1], width, 2 * width), bn_p(keys[2], 2 * width))
    w3, b3 = fold(*conv_p(keys[3], 2 * width, width), bn_p(keys[4], width))
    w4, b4 = fold(*conv_p(keys[5], width, 2 * width), bn_p(keys[6], 2 * width))
    w5, b5 = fold(*conv_p(keys[7], 2 * width, width), bn_p(keys[8], width))
    w6, b6 = conv_p(keys[9], width, 1)
    return dict(w1=w1, b1=b1, w2=w2, b2=b2, w3=w3, b3=b3,
                w4=w4, b4=b4, w5=w5, b5=b5, w6=w6, b6=b6)


if __name__ == "__main__":
    key = jax.random.PRNGKey(0)
    key, k_spect, k_params = jax.random.split(key, 3)

    width = 8            # Detection_ResNet_BN2 width -> Cmax = 16, L = 128 lanes
    H = W = 64           # spectrogram spatial size
    patch_size = 8       # -> 64 non-overlapping patches in eval mode
    spect = jax.random.normal(k_spect, (1, 1, H, W), jnp.float32)   # NCHW like PyTorch
    params = init_params(k_params, width)

    # One-time host-side prep (banded bf16 weights + roll-convention probe).
    prep = prepare_params(params, patch_size)

    fwd = jax.jit(fcn_spect_forward, static_argnums=(2,))
    out = jax.block_until_ready(fwd(spect, prep, patch_size))

    ref = jax.block_until_ready(fcn_spect_forward_ref(spect, params, patch_size))

    assert out.shape == spect.shape
    err = float(jnp.max(jnp.abs(out - ref)))
    ref_max = float(jnp.max(jnp.abs(ref)))
    # bf16 MXU inputs (f32 accumulation) through 6 stacked convs vs an f32 ref.
    assert err < 3e-2 * max(1.0, ref_max), f"mismatch: max err {err} (ref max {ref_max})"
    print("KERNEL_OK")
</pallas_src>

<mosaic_0001>
module attributes {stable_mosaic.version = 11 : i64} {
  func.func @k(%arg0: memref<8x128xf32, #tpu.memory_space<vmem>>, %arg1: memref<8x128xf32, #tpu.memory_space<vmem>>) attributes {dimension_semantics = [], scalar_prefetch = 0 : i64, scratch_operands = 0 : i64, tpu.core_type = #tpu.core_type<tc>} {
    %c0 = arith.constant 0 : index
    %c0_0 = arith.constant 0 : index
    %0 = vector.load %arg0[%c0, %c0_0] : memref<8x128xf32, #tpu.memory_space<vmem>>, vector<8x128xf32>
    %c1_i32 = arith.constant 1 : i32
    %1 = tpu.dynamic_rotate %0 by %c1_i32 dim 0 : vector<8x128xf32>, i32 -> vector<8x128xf32>
    %c0_1 = arith.constant 0 : index
    %c0_2 = arith.constant 0 : index
    %2 = vector.load %arg1[%c0_1, %c0_2] : memref<8x128xf32, #tpu.memory_space<vmem>>, vector<8x128xf32>
    tpu.vector_store %arg1[%c0_1, %c0_2], %1 {strides = array<i32>} : memref<8x128xf32, #tpu.memory_space<vmem>>, vector<8x128xf32>,
    return
  }
}

</mosaic_0001>

<bundles_post_ra>
// kernel: tpu_custom_call.1
= control target key start
LH: loop header
LB: loop body
LE: loop exit
PB: predicated region body
PF: predicated region fallthrough
CT: control target
= control target key end

     0   :  { %6 = vsyncpa [#allocation3], 0  ;;  %s125_s0 = inlined_call_operand.hbm [shape: f32[8,128], index: 0, kind: input, shape index: {}]   ;;  %s126_s1 = inlined_call_operand.hbm [shape: f32[8,128], index: 1, kind: output, shape index: {}]  }
   0x1   :  { %7 = vsyncpa [#allocation4], 0  ;;  %s89_s6 = smov [#allocation2]   ;;  %s41_s10 = scalar_lea.hbm %s125_s0, 128 }
   0x2   :  { %s14_s7 = sshll.u32 %s89_s6, 4  ;;  %p42_p0 = scmp.ne.s32.totalorder %s125_s0, %s41_s10  ;;  %s15_s7 = int_to_ptr.vmem [resolvable:$true] %s14_s7 }
   0x3   :  { %p45_p1 = scmp.lt.u32.totalorder %s41_s10, %s125_s0 }
   0x5   :  { %p47_p2 = pnand %p45_p1, %p42_p0 }
   0x7   :  { %50 = shalt.err (!%p47_p2)
}
   0x8   :  { %s51_s15 = scalar_lea.vmem %s15_s7, 128  ;;  %p56_p4 = scmp.lt.s32.totalorder %s15_s7, %s15_s7 }
   0x9   :  { %p52_p3 = scmp.ne.s32.totalorder %s15_s7, %s51_s15  ;;  %p57_p5 = scmp.lt.s32.totalorder %s51_s15, %s51_s15 }
   0xb   :  { %p58_p6 = por %p57_p5, %p56_p4 }
   0xd   :  { %p59_p7 = pnand %p58_p6, %p52_p3 }
   0xf   :  { %62 = shalt.err (!%p59_p7)
}
  0x10   :  { %17 = dma.hbm_to_vmem [thread:$0]  %s125_s0, 128, %s15_s7, [#allocation3]  }
  0x11   :  { %85 = dma.done.wait [#allocation3], 128  }
  0x12   :  { %86 = vsyncadd [#allocation3], 4294967168  ;;  %s90_s18 = smov [#allocation5]   ;;  %v21_v0 = vld [vmem:[#allocation2] sm:$0xff] }
  0x13   :  { %s30_s19 = sshll.u32 %s90_s18, 4  ;;  %v22_v1 = vrot.slane %v21_v0, 7  ;;  %s31_s19 = int_to_ptr.vmem [resolvable:$true] %s30_s19 }
  0x14   :  { %s63_s20 = scalar_lea.vmem %s31_s19, 128  ;;  %p68_p9 = scmp.lt.s32.totalorder %s31_s19, %s31_s19 }
  0x15   :  { %23 = vst [vmem:[#allocation5] sm:$0xff] %v22_v1  ;;  %p64_p8 = scmp.ne.s32.totalorder %s31_s19, %s63_s20  ;;  %p69_p10 = scmp.lt.s32.totalorder %s63_s20, %s63_s20 }
  0x17   :  { %p70_p11 = por %p69_p10, %p68_p9 }
  0x19   :  { %p71_p12 = pnand %p70_p11, %p64_p8 }
  0x1b   :  { %74 = shalt.err (!%p71_p12)
}
  0x1c   :  { %s75_s23 = scalar_lea.hbm %s126_s1, 128 }
  0x1d   :  { %p76_p13 = scmp.ne.s32.totalorder %s126_s1, %s75_s23  ;;  %p79_p0 = scmp.lt.u32.totalorder %s75_s23, %s126_s1 }
  0x1f   :  { %p81_p1 = pnand %p79_p0, %p76_p13 }
  0x21   :  { %84 = shalt.err (!%p81_p1)
}
  0x22   :  { %33 = dma.vmem_to_hbm [thread:$0]  %s31_s19, 128, %s126_s1, [#allocation4]  }
  0x23   :  { %87 = dma.done.wait [#allocation4], 128  }
  0x24   :  { %88 = vsyncadd [#allocation4], 4294967168 }
  0x25   :  { %37 = vsyncpa [#allocation3], 1 }
  0x26   :  { %38 = vsyncpa [#allocation4], 1 }

</bundles_post_ra>
